<compile_context>
chip_gen: v7x
topology: tpu7x:2x2x1
jax: 0.10.0
libtpu: 0.0.40
codegen_flags: <defaults>
</compile_context>

<pallas_src>
import math

import jax
import jax.numpy as jnp
from jax import lax
from jax.experimental import pallas as pl
from jax.experimental.pallas import tpu as pltpu


def _patch_embed_kernel(p_ref, w_ref, s_ref, o_ref):
    # p_ref: (tm, K) bf16 im2col patches; w_ref: (K, D) bf16 flattened conv weight
    # s_ref: (3, D) f32 -- row 0 = conv bias, row 1 = LN gamma, row 2 = LN beta
    # o_ref: (tm, D) output tile
    x = jnp.dot(p_ref[...], w_ref[...], preferred_element_type=jnp.float32)
    s = s_ref[...]
    x = x + s[0:1, :]
    # LayerNorm over the embed dim (eps matches nn.LayerNorm default 1e-5), f32.
    mean = jnp.mean(x, axis=-1, keepdims=True)
    xc = x - mean
    var = jnp.mean(xc * xc, axis=-1, keepdims=True)
    xhat = xc * lax.rsqrt(var + 1e-5)
    o_ref[...] = (xhat * s[1:2, :] + s[2:3, :]).astype(o_ref.dtype)


def _round_up(n, m):
    return ((n + m - 1) // m) * m


def overlap_patch_embed(x, conv_w, conv_b, ln_w, ln_b, *,
                        patch_size=7, stride=4, tm=512,
                        compute_dtype=jnp.bfloat16):
    """x: (B, C, H, W).  conv_w: (D, C, kh, kw).  Returns ((B, Ho*Wo, D), Ho, Wo)."""
    B, C, H, W = x.shape
    D = conv_w.shape[0]
    pad = patch_size // 2
    Ho = (H + 2 * pad - patch_size) // stride + 1
    Wo = (W + 2 * pad - patch_size) // stride + 1
    K = C * patch_size * patch_size
    N = B * Ho * Wo

    # --- im2col in NHWC order (no big transpose of the expanded patch tensor) ---
    x_nhwc = jnp.transpose(x, (0, 2, 3, 1))                        # (B, H, W, C)
    x_pad = jnp.pad(x_nhwc, ((0, 0), (pad, pad), (pad, pad), (0, 0)))
    cols = []
    for ki in range(patch_size):
        for kj in range(patch_size):
            cols.append(
                lax.slice(
                    x_pad,
                    (0, ki, kj, 0),
                    (B, ki + stride * (Ho - 1) + 1, kj + stride * (Wo - 1) + 1, C),
                    (1, stride, stride, 1),
                )  # (B, Ho, Wo, C)
            )
    patches = jnp.stack(cols, axis=3)                              # (B, Ho, Wo, kh*kw, C)
    patches = patches.reshape(N, K).astype(compute_dtype)
    # TODO(synk): for very large images the ~3x im2col expansion could be
    # avoided with manual strided DMAs from an HBM-resident padded image
    # (memory_space=pl.ANY); not needed at SegFormer stage sizes.

    # Conv weight (D, C, kh, kw) -> (kh, kw, C, D) -> (K, D), matching the
    # (kh, kw, C) patch flatten order above.
    w_flat = jnp.transpose(conv_w, (2, 3, 1, 0)).reshape(K, D).astype(compute_dtype)

    # Merge bias / gamma / beta into one small operand.
    scales = jnp.stack([conv_b, ln_w, ln_b], axis=0).astype(jnp.float32)  # (3, D)

    # Row tile: big for large N (amortize grid-step overhead, saturate HBM
    # streaming), clamped to the 8-aligned token count for tiny problems so we
    # never pad a handful of tokens up to a full 512-row tile.
    tm = max(8, tm - (tm % 8))                                     # sublane-aligned tile
    tm = min(tm, _round_up(N, 8))
    n_tiles = pl.cdiv(N, tm)
    N_pad = n_tiles * tm
    if N_pad != N:
        patches = jnp.pad(patches, ((0, N_pad - N), (0, 0)))

    # VMEM budget: double-buffered patch tiles + resident weight + out tiles.
    in_bytes = jnp.dtype(compute_dtype).itemsize
    vmem_need = 2 * tm * K * in_bytes + K * D * in_bytes + 2 * tm * D * 4 + 3 * D * 4
    vmem_limit = int(min(max(4 * vmem_need, 8 * 1024 * 1024), 32 * 1024 * 1024))

    cost = pl.CostEstimate(
        flops=2 * N_pad * K * D,
        transcendentals=N_pad,  # one rsqrt per token
        bytes_accessed=N_pad * K * in_bytes + K * D * in_bytes + N_pad * D * 4 + 3 * D * 4,
    )

    out = pl.pallas_call(
        _patch_embed_kernel,
        out_shape=jax.ShapeDtypeStruct((N_pad, D), x.dtype),
        grid_spec=pltpu.PrefetchScalarGridSpec(
            num_scalar_prefetch=0,
            grid=(n_tiles,),
            in_specs=[
                pl.BlockSpec((tm, K), lambda i: (i, 0)),   # patch rows (tiled)
                pl.BlockSpec((K, D), lambda i: (0, 0)),    # flattened conv weight (resident)
                pl.BlockSpec((3, D), lambda i: (0, 0)),    # [conv_b; ln_w; ln_b]
            ],
            out_specs=pl.BlockSpec((tm, D), lambda i: (i, 0)),
        ),
        compiler_params=pltpu.CompilerParams(
            dimension_semantics=("parallel",),
            vmem_limit_bytes=vmem_limit,
        ),
        cost_estimate=cost,
    )(patches, w_flat, scales)

    # TODO(synk): with D=32 the store uses 32/128 lanes; a lane-dense (N*D//128, 128)
    # reinterpretation would need an in-kernel relayout crossing (8,128) tiles, so it
    # is left to downstream consumers if stores ever become the binding slot.
    out = out[:N].reshape(B, Ho * Wo, D)
    return out, Ho, Wo


def _reference(x, conv_w, conv_b, ln_w, ln_b, *, patch_size=7, stride=4):
    pad = patch_size // 2
    y = lax.conv_general_dilated(
        x, conv_w, window_strides=(stride, stride),
        padding=((pad, pad), (pad, pad)),
        dimension_numbers=("NCHW", "OIHW", "NCHW"),
    ) + conv_b[None, :, None, None]
    B, D, Ho, Wo = y.shape
    y = y.reshape(B, D, Ho * Wo).transpose(0, 2, 1)  # (B, N, D)
    mean = jnp.mean(y, axis=-1, keepdims=True)
    var = jnp.mean((y - mean) ** 2, axis=-1, keepdims=True)
    y = (y - mean) * lax.rsqrt(var + 1e-5) * ln_w + ln_b
    return y, Ho, Wo


if __name__ == "__main__":
    # Small, module-consistent shapes: patch_size=7, stride=4, in_chans=3, embed_dim=32.
    B, C, H, W = 2, 3, 16, 16
    embed_dim, patch_size, stride = 32, 7, 4

    key = jax.random.PRNGKey(0)
    kx, kw = jax.random.split(key)

    x = jax.random.normal(kx, (B, C, H, W), dtype=jnp.float32)

    # Deterministic init matching _init_weights:
    #   Conv2d: normal(0, sqrt(2 / fan_out)), fan_out = kh*kw*embed_dim; bias = 0.
    #   LayerNorm: weight = 1, bias = 0.
    fan_out = patch_size * patch_size * embed_dim
    conv_w = jax.random.normal(kw, (embed_dim, C, patch_size, patch_size),
                               dtype=jnp.float32) * math.sqrt(2.0 / fan_out)
    conv_b = jnp.zeros((embed_dim,), dtype=jnp.float32)
    ln_w = jnp.ones((embed_dim,), dtype=jnp.float32)
    ln_b = jnp.zeros((embed_dim,), dtype=jnp.float32)

    (out, Ho, Wo) = overlap_patch_embed(x, conv_w, conv_b, ln_w, ln_b,
                                        patch_size=patch_size, stride=stride)
    out = jax.block_until_ready(out)

    ref, Ho_r, Wo_r = _reference(x, conv_w, conv_b, ln_w, ln_b,
                                 patch_size=patch_size, stride=stride)
    assert (Ho, Wo) == (Ho_r, Wo_r)
    assert out.shape == (B, Ho * Wo, embed_dim)
    # bf16 operands vs f32 reference on LayerNorm-normalized outputs: ~1% scale error.
    err = float(jnp.max(jnp.abs(out - ref)))
    assert jnp.allclose(out, ref, atol=7e-2, rtol=2e-2), err

    print("KERNEL_OK")
</pallas_src>

<mosaic_0001>
module attributes {stable_mosaic.version = 11 : i64} {
  func.func @_patch_embed_kernel(%arg0: i32, %arg1: memref<32x147xbf16, #tpu.memory_space<vmem>>, %arg2: memref<147x32xbf16, #tpu.memory_space<vmem>>, %arg3: memref<3x32xf32, #tpu.memory_space<vmem>>, %arg4: memref<32x32xf32, #tpu.memory_space<vmem>>) attributes {dimension_semantics = [#tpu.dimension_semantics<parallel>], iteration_bounds = array<i64: 1>, scalar_prefetch = 0 : i64, scratch_operands = 0 : i64, tpu.core_type = #tpu.core_type<tc>, window_params = [{transform_indices = @transform_0, window_bounds = array<i64: 32, 147>}, {pipeline_mode = #tpu.pipeline_mode<synchronous>, transform_indices = @transform_1, window_bounds = array<i64: 147, 32>}, {pipeline_mode = #tpu.pipeline_mode<synchronous>, transform_indices = @transform_2, window_bounds = array<i64: 3, 32>}, {transform_indices = @transform_3, window_bounds = array<i64: 32, 32>}]} {
    %c0 = arith.constant 0 : index
    %c0_0 = arith.constant 0 : index
    %0 = vector.load %arg1[%c0, %c0_0] : memref<32x147xbf16, #tpu.memory_space<vmem>>, vector<32x147xbf16>
    %c0_1 = arith.constant 0 : index
    %c0_2 = arith.constant 0 : index
    %1 = vector.load %arg2[%c0_1, %c0_2] : memref<147x32xbf16, #tpu.memory_space<vmem>>, vector<147x32xbf16>
    %cst = arith.constant dense<0.000000e+00> : vector<32x32xf32>
    %2 = tpu.matmul %0, %1, %cst {dimension_numbers = #tpu.dot_dimension_numbers<[1], [0], [0], [1], [0, 0, 1, 1], [], []>} : vector<32x147xbf16>, vector<147x32xbf16>, vector<32x32xf32> -> vector<32x32xf32>
    %c0_3 = arith.constant 0 : index
    %c0_4 = arith.constant 0 : index
    %3 = vector.load %arg3[%c0_3, %c0_4] : memref<3x32xf32, #tpu.memory_space<vmem>>, vector<3x32xf32>
    %4 = vector.extract_strided_slice %3 {offsets = [0, 0], sizes = [1, 32], strides = [1, 1]} : vector<3x32xf32> to vector<1x32xf32>
    %5 = vector.broadcast %4 : vector<1x32xf32> to vector<32x32xf32>
    %6 = arith.addf %2, %5 : vector<32x32xf32>
    %cst_5 = arith.constant dense<0.000000e+00> : vector<32xf32>
    %7 = vector.multi_reduction <add>, %6, %cst_5 [1] : vector<32x32xf32> to vector<32xf32>
    %8 = vector.shape_cast %7 : vector<32xf32> to vector<32x1xf32>
    %cst_6 = arith.constant 3.200000e+01 : f32
    %9 = vector.broadcast %cst_6 : f32 to vector<32x1xf32>
    %10 = arith.divf %8, %9 : vector<32x1xf32>
    %11 = vector.broadcast %10 : vector<32x1xf32> to vector<32x32xf32>
    %12 = arith.subf %6, %11 : vector<32x32xf32>
    %13 = arith.mulf %12, %12 : vector<32x32xf32>
    %cst_7 = arith.constant dense<0.000000e+00> : vector<32xf32>
    %14 = vector.multi_reduction <add>, %13, %cst_7 [1] : vector<32x32xf32> to vector<32xf32>
    %15 = vector.shape_cast %14 : vector<32xf32> to vector<32x1xf32>
    %cst_8 = arith.constant 3.200000e+01 : f32
    %16 = vector.broadcast %cst_8 : f32 to vector<32x1xf32>
    %17 = arith.divf %15, %16 : vector<32x1xf32>
    %cst_9 = arith.constant 9.99999974E-6 : f32
    %18 = vector.broadcast %cst_9 : f32 to vector<32x1xf32>
    %19 = arith.addf %17, %18 : vector<32x1xf32>
    %20 = math.rsqrt %19 : vector<32x1xf32>
    %21 = vector.broadcast %20 : vector<32x1xf32> to vector<32x32xf32>
    %22 = arith.mulf %12, %21 : vector<32x32xf32>
    %23 = vector.extract_strided_slice %3 {offsets = [1, 0], sizes = [1, 32], strides = [1, 1]} : vector<3x32xf32> to vector<1x32xf32>
    %24 = vector.broadcast %23 : vector<1x32xf32> to vector<32x32xf32>
    %25 = arith.mulf %22, %24 : vector<32x32xf32>
    %26 = vector.extract_strided_slice %3 {offsets = [2, 0], sizes = [1, 32], strides = [1, 1]} : vector<3x32xf32> to vector<1x32xf32>
    %27 = vector.broadcast %26 : vector<1x32xf32> to vector<32x32xf32>
    %28 = arith.addf %25, %27 : vector<32x32xf32>
    %c0_10 = arith.constant 0 : index
    %c0_11 = arith.constant 0 : index
    %29 = vector.load %arg4[%c0_10, %c0_11] : memref<32x32xf32, #tpu.memory_space<vmem>>, vector<32x32xf32>
    tpu.vector_store %arg4[%c0_10, %c0_11], %28 {strides = array<i32>} : memref<32x32xf32, #tpu.memory_space<vmem>>, vector<32x32xf32>,
    return
  }
  func.func @transform_0(%arg0: i32) -> (i32, i32) {
    %c0_i32 = arith.constant 0 : i32
    %c0_i32_0 = arith.constant 0 : i32
    return %arg0, %c0_i32 : i32, i32
  }
  func.func @transform_1(%arg0: i32) -> (i32, i32) {
    %c0_i32 = arith.constant 0 : i32
    %c0_i32_0 = arith.constant 0 : i32
    %c0_i32_1 = arith.constant 0 : i32
    return %c0_i32, %c0_i32_0 : i32, i32
  }
  func.func @transform_2(%arg0: i32) -> (i32, i32) {
    %c0_i32 = arith.constant 0 : i32
    %c0_i32_0 = arith.constant 0 : i32
    %c0_i32_1 = arith.constant 0 : i32
    return %c0_i32, %c0_i32_0 : i32, i32
  }
  func.func @transform_3(%arg0: i32) -> (i32, i32) {
    %c0_i32 = arith.constant 0 : i32
    %c0_i32_0 = arith.constant 0 : i32
    return %arg0, %c0_i32 : i32, i32
  }
}

</mosaic_0001>

<bundles_post_ra>
// kernel: tpu_custom_call.1
= control target key start
LH: loop header
LB: loop body
LE: loop exit
PB: predicated region body
PF: predicated region fallthrough
CT: control target
= control target key end

     0   :  { %v361_v1 = vmov 0   ;;  %vm119_vm0 = vcmask 154624   ;;  %s465_s0 = inlined_call_operand.vmem [shape: bf16[32,147], index: 0, kind: input, shape index: {}]   ;;  %s466_s1 = inlined_call_operand.vmem [shape: bf16[147,32], index: 1, kind: input, shape index: {}]   ;;  %s467_s2 = inlined_call_operand.vmem [shape: f32[3,32], index: 2, kind: input, shape index: {}]   ;;  %s468_s3 = inlined_call_operand.hbm [shape: f32[32,32], index: 3, kind: output, shape index: {}]  }
   0x1   :  { %v313_v0 = vld [vmem:[%s466_s1] sm:$0xff]   ;;  %133 = vmatprep.subr.bf16.mxu0 %v361_v1  ;;  %288 = vmatprep.subr.bf16.mxu1 %v361_v1  ;;  %v314_v2 = vld [vmem:[%s466_s1 + $0x8] sm:$0xff]   ;;  %v315_v3 = vld [vmem:[%s466_s1 + $0x10] sm:$0xff]  }
   0x2   :  { %134 = vmatpush1.bf16.msra.mxu0 %v313_v0  ;;  %298 = vmatpush1.bf16.msra.mxu1 %v313_v0  ;;  %v316_v4 = vld [vmem:[%s466_s1 + $0x18] sm:$0xff]   ;;  %v325_v5 = vld [vmem:[%s465_s0 + $0x4] ss:$8 sps:$4 sm:$0xff]  }
   0x3   :  { %135 = vmatprep.subr.bf16.mxu0 %v361_v1  ;;  %289 = vmatprep.subr.bf16.mxu1 %v361_v1  ;;  %v328_v6 = vld [vmem:[%s465_s0 + $0x14] ss:$8 sps:$4 sm:$0xff]  }
   0x4   :  { %286 = vmatprep.mubr.msk.bf16.mxu0 %vm119_vm0, %v325_v5 }
   0x6   :  { %136 = vmatpush1.bf16.msra.mxu0 %v314_v2  ;;  %299 = vmatpush1.bf16.msra.mxu1 %v314_v2 }
   0x7   :  { %137 = vmatprep.subr.bf16.mxu0 %v361_v1  ;;  %290 = vmatprep.subr.bf16.mxu1 %v361_v1 }
   0xa   :  { %138 = vmatpush1.bf16.msra.mxu0 %v315_v3  ;;  %300 = vmatpush1.bf16.msra.mxu1 %v315_v3 }
   0xb   :  { %139 = vmatprep.subr.bf16.mxu0 %v361_v1  ;;  %291 = vmatprep.subr.bf16.mxu1 %v361_v1 }
   0xc   :  { %8 = vsyncpa [#allocation3], 0  ;;  %v317_v7 = vld [vmem:[%s466_s1 + $0x20] sm:$0xff]   ;;  %287 = vmatprep.mubr.msk.bf16.mxu1 %vm119_vm0, %v328_v6  ;;  %v318_v8 = vld [vmem:[%s466_s1 + $0x28] sm:$0xff]   ;;  %vm126_vm1 = vcmask 1040384   ;;  %vm127_vm2 = vcmask 1041408   ;;  %v40_v19 = vlaneseq }
   0xd   :  { %v319_v9 = vld [vmem:[%s466_s1 + $0x30] sm:$0xff]   ;;  %v320_v10 = vld [vmem:[%s466_s1 + $0x38] sm:$0xff]   ;;  %v362_v11 = vmov 65535   ;;  %v321_v13 = vld [vmem:[%s466_s1 + $0x40] sm:$0xff]   ;;  %vm182_vm3 = vcmask 261120  }
   0xe   :  { %140 = vmatpush1.bf16.msra.mxu0 %v316_v4  ;;  %301 = vmatpush1.bf16.msra.mxu1 %v316_v4  ;;  %v128_v12 = vsel %vm126_vm1, 4294967295, %v362_v11  ;;  %v322_v14 = vld [vmem:[%s466_s1 + $0x48] ss:$0 sps:$4 sm:$0x33]   ;;  %v326_v18 = vld [vmem:[%s465_s0 + $0x10] ss:$8 sps:$4 sm:$0xff]  }
   0xf   :  { %141 = vmatprep.subr.bf16.mxu0 %v361_v1  ;;  %292 = vmatprep.subr.bf16.mxu1 %v361_v1  ;;  %v129_v15 = vsel %vm127_vm2, %v128_v12, 0  ;;  %v323_v17 = vld [vmem:[%s465_s0] ss:$8 sps:$4 sm:$0xff]   ;;  %v428_v20 = vshrl.u32 %v40_v19, 7  ;;  %s363_s0 = smov [#allocation2]  }
  0x10   :  { %v131_v16 = vand.u32 %v322_v14, %v129_v15  ;;  %v434_v22 = vld [vmem:[%s467_s2] sm:$0x7]  ;;  %s261_s2 = sshll.u32 %s363_s0, 4  ;;  %s262_s2 = int_to_ptr.vmem [resolvable:$true] %s261_s2 }
  0x11   :  { %v42_v21 = vsub.s32 0, %v428_v20  ;;  %s337_s14 = scalar_lea.vmem %s262_s2, 512  ;;  %p342_p1 = scmp.lt.s32.totalorder %s262_s2, %s262_s2 }
  0x12   :  { %142 = vmatpush1.bf16.msra.mxu0 %v317_v7  ;;  %302 = vmatpush1.bf16.msra.mxu1 %v317_v7  ;;  %v238_v7 = vsub.s32 1, %v428_v20  ;;  %p338_p0 = scmp.ne.s32.totalorder %s262_s2, %s337_s14  ;;  %p343_p2 = scmp.lt.s32.totalorder %s337_s14, %s337_s14 }
  0x13   :  { %143 = vmatprep.subr.bf16.mxu0 %v361_v1  ;;  %293 = vmatprep.subr.bf16.mxu1 %v361_v1  ;;  %v43_v23 = vrot.slane %v434_v22, %v42_v21 }
  0x14   :  { %p344_p3 = por %p343_p2, %p342_p1 }
  0x16   :  { %144 = vmatpush1.bf16.msra.mxu0 %v318_v8  ;;  %303 = vmatpush1.bf16.msra.mxu1 %v318_v8  ;;  %p345_p4 = pnand %p344_p3, %p338_p0 }
  0x17   :  { %145 = vmatprep.subr.bf16.mxu0 %v361_v1  ;;  %294 = vmatprep.subr.bf16.mxu1 %v361_v1 }
  0x1a   :  { %146 = vmatpush1.bf16.msra.mxu0 %v319_v9  ;;  %304 = vmatpush1.bf16.msra.mxu1 %v319_v9  ;;  %v246_v9 = vsub.s32 2, %v428_v20 }
  0x1b   :  { %147 = vmatprep.subr.bf16.mxu0 %v361_v1  ;;  %295 = vmatprep.subr.bf16.mxu1 %v361_v1 }
  0x1c   :  { %v247_v12 = vrot.slane %v434_v22, %v246_v9 }
  0x1e   :  { %148 = vmatpush1.bf16.msra.mxu0 %v320_v10  ;;  %305 = vmatpush1.bf16.msra.mxu1 %v320_v10  ;;  %v239_v10 = vrot.slane %v434_v22, %v238_v7 }
  0x1f   :  { %149 = vmatprep.subr.bf16.mxu0 %v361_v1  ;;  %296 = vmatprep.subr.bf16.mxu1 %v361_v1 }
  0x22   :  { %150 = vmatpush1.bf16.msra.mxu0 %v321_v13  ;;  %306 = vmatpush1.bf16.msra.mxu1 %v321_v13 }
  0x23   :  { %151 = vmatprep.subr.bf16.mxu0 %v361_v1  ;;  %297 = vmatprep.subr.bf16.mxu1 %v361_v1 }
  0x26   :  { %152 = vmatpush1.bf16.msra.mxu0 %v131_v16  ;;  %307 = vmatpush1.bf16.msra.mxu1 %v131_v16 }
  0x29   :  { %166 = vmatmul.mubr.bf16.vlgmr.msra.gmra.mrb[0].mxu0 %v323_v17  ;;  %174 = vmatmul.mubr.bf16.vlgmr.msra.gmra.mrb[0].mxu1 %v326_v18 }
  0xfc   :  { %v167_v24 = vpop.f32.mrb[0].mxu0  ;;  %v175_v25 = vpop.f32.mrb[0].mxu1 }
  0xfd   :  { %v168_v26 = vadd.f32 %v167_v24, %v43_v23  ;;  %v176_v27 = vadd.f32 %v175_v25, %v43_v23  ;;  %v169_v28 = vpop.f32.mrb[1].mxu0  ;;  %v177_v29 = vpop.f32.mrb[1].mxu1 }
  0xfe   :  { %v170_v30 = vpop.f32.mrb[2].mxu0  ;;  %v178_v31 = vpop.f32.mrb[2].mxu1 }
  0xff   :  { %v171_v32 = vadd.f32 %v170_v30, %v43_v23  ;;  %v172_v33 = vpop.f32.mrb[3].mxu0  ;;  %v179_v34 = vadd.f32 %v178_v31, %v43_v23  ;;  %v180_v35 = vpop.f32.mrb[3].mxu1  ;;  %v189_v36 = vsel %vm182_vm3, %v176_v27, 0.0  ;;  %v183_v37 = vsel %vm182_vm3, %v168_v26, 0.0 }
 0x100   :  { %190 = vadd.xlane.f32.xlu1 %v189_v36  ;;  %184 = vadd.xlane.f32.xlu0 %v183_v37 }
 0x101   :  { %v192_v38 = vsel %vm182_vm3, %v179_v34, 0.0  ;;  %v186_v39 = vsel %vm182_vm3, %v171_v32, 0.0 }
 0x104   :  { %193 = vadd.xlane.f32.xlu1 %v192_v38  ;;  %187 = vadd.xlane.f32.xlu0 %v186_v39 }
 0x18d   :  { %v191_v40 = vpop.xlane.xlu1 %190  ;;  %v185_v41 = vpop.xlane.xlu0 %184 }
 0x18e   :  { %v198_v42 = vmul.f32 0.03125, %v191_v40  ;;  %v196_v43 = vmul.f32 0.03125, %v185_v41 }
 0x190   :  { %v202_v44 = vsub.f32 %v176_v27, %v198_v42  ;;  %v200_v45 = vsub.f32 %v168_v26, %v196_v43 }
 0x191   :  { %v194_v46 = vpop.xlane.xlu1 %193  ;;  %v188_v47 = vpop.xlane.xlu0 %187 }
 0x192   :  { %v199_v48 = vmul.f32 0.03125, %v194_v46  ;;  %v197_v49 = vmul.f32 0.03125, %v188_v47  ;;  %v204_v50 = vmul.f32 %v200_v45, %v200_v45  ;;  %v206_v54 = vmul.f32 %v202_v44, %v202_v44 }
 0x194   :  { %v203_v51 = vsub.f32 %v179_v34, %v199_v48  ;;  %v201_v52 = vsub.f32 %v171_v32, %v197_v49  ;;  %v208_v53 = vsel %vm182_vm3, %v204_v50, 0.0  ;;  %v214_v56 = vsel %vm182_vm3, %v206_v54, 0.0 }
 0x195   :  { %209 = vadd.xlane.f32.xlu0 %v208_v53 }
 0x196   :  { %v205_v55 = vmul.f32 %v201_v52, %v201_v52  ;;  %v207_v58 = vmul.f32 %v203_v51, %v203_v51 }
 0x198   :  { %v211_v57 = vsel %vm182_vm3, %v205_v55, 0.0  ;;  %v217_v59 = vsel %vm182_vm3, %v207_v58, 0.0 }
 0x199   :  { %215 = vadd.xlane.f32.xlu0 %v214_v56  ;;  %212 = vadd.xlane.f32.xlu1 %v211_v57 }
 0x19d   :  { %218 = vadd.xlane.f32.xlu1 %v217_v59 }
 0x222   :  { %v210_v60 = vpop.xlane.xlu0 %209 }
 0x223   :  { %v220_v61 = vmul.f32 0.03125, %v210_v60 }
 0x225   :  { %v224_v62 = vadd.f32 1e-05, %v220_v61 }
 0x226   :  { %v213_v63 = vpop.xlane.xlu1 %212  ;;  %v216_v0 = vpop.xlane.xlu0 %215 }
 0x227   :  { %329 = vrsqrt.f32 %v224_v62  ;;  %v221_v1 = vmul.f32 0.03125, %v213_v63  ;;  %v222_v2 = vmul.f32 0.03125, %v216_v0 }
 0x229   :  { %v225_v3 = vadd.f32 1e-05, %v221_v1  ;;  %v226_v4 = vadd.f32 1e-05, %v222_v2 }
 0x22a   :  { %v219_v5 = vpop.xlane.xlu1 %218 }
 0x22b   :  { %331 = vrsqrt.f32 %v225_v3  ;;  %v223_v6 = vmul.f32 0.03125, %v219_v5 }
 0x22c   :  { %333 = vrsqrt.f32 %v226_v4 }
 0x22d   :  { %v227_v8 = vadd.f32 1e-05, %v223_v6 }
 0x22f   :  { %335 = vrsqrt.f32 %v227_v8 }
 0x231   :  { %v330_v11 = vpop.eup %329 }
 0x232   :  { %v232_v13 = vmul.f32 %v330_v11, %v200_v45 }
 0x234   :  { %v240_v14 = vmul.f32 %v239_v10, %v232_v13 }
 0x235   :  { %v332_v15 = vpop.eup %331 }
 0x236   :  { %v334_v16 = vpop.eup %333  ;;  %v248_v17 = vadd.f32 %v247_v12, %v240_v14  ;;  %v233_v18 = vmul.f32 %v332_v15, %v201_v52 }
 0x237   :  { %v234_v19 = vmul.f32 %v334_v16, %v202_v44 }
 0x238   :  { %252 = vst.msk [vmem:[#allocation2] sm:$0xff] %vm182_vm3, %v248_v17  ;;  %v241_v21 = vmul.f32 %v239_v10, %v233_v18 }
 0x239   :  { %v336_v23 = vpop.eup %335  ;;  %v242_v24 = vmul.f32 %v239_v10, %v234_v19 }
 0x23a   :  { %v249_v25 = vadd.f32 %v247_v12, %v241_v21  ;;  %v235_v20 = vmul.f32 %v336_v23, %v203_v51 }
 0x23b   :  { %v250_v26 = vadd.f32 %v247_v12, %v242_v24 }
 0x23c   :  { %253 = vst.msk [vmem:[#allocation2 + $0x8] sm:$0xff] %vm182_vm3, %v249_v25  ;;  %v243_v22 = vmul.f32 %v239_v10, %v235_v20 }
 0x23d   :  { %254 = vst.msk [vmem:[#allocation2 + $0x10] sm:$0xff] %vm182_vm3, %v250_v26 }
 0x23e   :  { %v251_v27 = vadd.f32 %v247_v12, %v243_v22 }
 0x240   :  { %255 = vst.msk [vmem:[#allocation2 + $0x18] sm:$0xff] %vm182_vm3, %v251_v27 }
 0x241   :  { %348 = shalt.err (!%p345_p4)
}
 0x242   :  { %s349_s17 = scalar_lea.hbm %s468_s3, 512 }
 0x243   :  { %p350_p5 = scmp.ne.s32.totalorder %s468_s3, %s349_s17  ;;  %p353_p6 = scmp.lt.u32.totalorder %s349_s17, %s468_s3 }
 0x245   :  { %p355_p7 = pnand %p353_p6, %p350_p5 }
 0x247   :  { %358 = shalt.err (!%p355_p7)
}
 0x248   :  { %s364_s22 = smov 128   ;;  %s365_s23 = smov 8  }
 0x249   :  { %267 = dma.vmem_to_hbm [thread:$0]  %s262_s2, 512, %s468_s3, [#allocation3], %s364_s22, %s364_s22, %s365_s23  }
 0x24a   :  { %359 = dma.done.wait [#allocation3], 512  }
 0x24b   :  { %360 = vsyncadd [#allocation3], 4294966784 }
 0x24c   :  { %271 = vsyncpa [#allocation3], 1 }

</bundles_post_ra>
